<compile_context>
chip_gen: v7x
topology: tpu7x:2x2x1
jax: 0.10.0
libtpu: 0.0.40
codegen_flags: <defaults>
</compile_context>

<pallas_src>
import functools

import jax
import jax.numpy as jnp
from jax.experimental import pallas as pl
from jax.experimental.pallas import tpu as pltpu


def _round_up(a, b):
    return ((a + b - 1) // b) * b


def _linear_kernel_direct(x_ref, w_ref, b_ref, o_ref):
    # Single K chunk: write the output tile directly (no accumulator scratch).
    # x_ref: (TM, K)  w_ref: (K, TN)  b_ref: (1, TN) f32  o_ref: (TM, TN)
    acc = jnp.dot(x_ref[...], w_ref[...], preferred_element_type=jnp.float32)
    o_ref[...] = (acc + b_ref[...]).astype(o_ref.dtype)


def _linear_kernel_acc(x_ref, w_ref, b_ref, o_ref, acc_ref):
    # K-tiled path: f32 accumulator persists across the (last) K grid axis.
    k = pl.program_id(2)

    @pl.when(k == 0)
    def _():
        acc_ref[...] = jnp.zeros_like(acc_ref)

    acc_ref[...] += jnp.dot(
        x_ref[...], w_ref[...], preferred_element_type=jnp.float32
    )

    @pl.when(k == pl.num_programs(2) - 1)
    def _():
        o_ref[...] = (acc_ref[...] + b_ref[...]).astype(o_ref.dtype)


@functools.partial(jax.jit, static_argnames=("tile_m", "tile_n", "tile_k"))
def visual_to_semantic(x, weight, bias, *, tile_m=512, tile_n=512, tile_k=None):
    """y = x @ weight.T + bias, matching nn.Linear(hidden_size, num_classes).

    x      : (batch, seq, hidden)
    weight : (num_classes, hidden)   -- PyTorch Linear weight layout
    bias   : (num_classes,)
    returns: (batch, seq, num_classes)
    """
    batch, seq, hidden = x.shape
    num_classes, h_w = weight.shape
    assert h_w == hidden, "weight must be (num_classes, hidden)"
    m = batch * seq

    dt = x.dtype
    itemsize = jnp.dtype(dt).itemsize
    out_itemsize = itemsize
    # Sublane granularity: 8 rows (f32), 16 (bf16), 32 (8-bit).
    sub = max(8, 32 // itemsize)

    # Compute dtype follows the activations; accumulate in f32 in-kernel.
    # One-time transpose to (H, C): MXU-native RHS layout, no in-kernel vxpose.
    w_t = weight.astype(dt).T
    b2d = bias.astype(jnp.float32).reshape(1, num_classes)
    x2d = x.reshape(m, hidden)

    # ---- tile sizing ----------------------------------------------------
    # Per-step VMEM footprint budget; safe for v7x's 64 MiB physical VMEM
    # (with double-buffering and compiler scratch headroom).
    budget = 36 * 1024 * 1024

    tn = min(tile_n, _round_up(num_classes, 128))
    tn = _round_up(tn, 128)                       # lane-dense output stores
    tm = min(tile_m, _round_up(m, sub))
    tm = _round_up(tm, sub)

    # v7x has 2 TensorCores per chip: make sure at least two blocks exist on a
    # "parallel" axis when the grid would otherwise collapse to a single block.
    if pl.cdiv(m, tm) * pl.cdiv(num_classes, tn) == 1:
        if tm >= 2 * sub and m > sub:
            tm = _round_up(pl.cdiv(m, 2), sub)
        elif tn >= 256:
            tn = tn // 2

    def footprint(tm_, tn_, tk_, tiled_k):
        f = 2 * (tm_ * tk_ + tk_ * tn_) * itemsize   # x, w blocks (dbl-buffered)
        f += 2 * tn_ * 4                             # bias block (f32)
        f += 2 * tm_ * tn_ * out_itemsize            # output block
        if tiled_k:
            f += tm_ * tn_ * 4                       # f32 accumulator scratch
        return f

    # K (hidden) handling: take it whole when it fits the budget, otherwise
    # stream it in 128-multiple chunks with an f32 accumulator.
    if tile_k is not None:
        tk = tile_k
    elif footprint(tm, tn, hidden, False) <= budget:
        tk = hidden
    else:
        tk = None
        for cand in (2048, 1024, 512, 256, 128):
            if footprint(tm, tn, cand, True) <= budget:
                tk = cand
                break
        if tk is None:
            tk = 128
            while tm > sub and footprint(tm, tn, tk, True) > budget:
                tm = _round_up(pl.cdiv(tm, 2), sub)

    if tk != hidden:
        tk = _round_up(min(tk, _round_up(hidden, 128)), 128)
        h_pad = _round_up(hidden, tk)
        if h_pad != hidden:
            # Zero-padding along K is numerically exact (0-contributions).
            # Only hit for large hidden that is not a multiple of the K tile.
            x2d = jnp.pad(x2d, ((0, 0), (0, h_pad - hidden)))
            w_t = jnp.pad(w_t, ((0, h_pad - hidden), (0, 0)))
    else:
        h_pad = hidden

    gm = pl.cdiv(m, tm)
    gn = pl.cdiv(num_classes, tn)
    gk = h_pad // tk

    # ---- grid ordering: keep the expensive operand resident --------------
    # Re-stream whichever operand costs less extra HBM traffic.  For typical
    # SRN shapes (small num_classes) gn == gk == 1 and the whole transposed
    # weight + bias stay resident in VMEM -> weight read from HBM exactly once.
    if gk == 1:
        m_outer_extra = (gm - 1) * num_classes * hidden if gn > 1 else 0
        n_outer_extra = (gn - 1) * m * hidden if gm > 1 else 0
        m_outer = m_outer_extra <= n_outer_extra
    else:
        m_outer = True

    if m_outer:
        grid = (gm, gn, gk)
        x_map = lambda i, j, k: (i, k)
        w_map = lambda i, j, k: (k, j)
        b_map = lambda i, j, k: (0, j)
        o_map = lambda i, j, k: (i, j)
    else:
        grid = (gn, gm, gk)
        x_map = lambda j, i, k: (i, k)
        w_map = lambda j, i, k: (k, j)
        b_map = lambda j, i, k: (0, j)
        o_map = lambda j, i, k: (i, j)

    if gk == 1:
        kernel = _linear_kernel_direct
        scratch = []
    else:
        kernel = _linear_kernel_acc
        scratch = [pltpu.VMEM((tm, tn), jnp.float32)]

    fp = footprint(tm, tn, tk, gk > 1)
    vmem_limit = min(max(int(fp * 1.3) + (2 << 20), 16 << 20), 56 << 20)

    flops = 2 * m * num_classes * hidden
    bytes_accessed = (
        m * h_pad * itemsize
        + h_pad * num_classes * itemsize
        + num_classes * 4
        + m * num_classes * out_itemsize
    )

    out2d = pl.pallas_call(
        kernel,
        out_shape=jax.ShapeDtypeStruct((m, num_classes), dt),
        grid_spec=pltpu.PrefetchScalarGridSpec(
            num_scalar_prefetch=0,
            grid=grid,
            in_specs=[
                pl.BlockSpec((tm, tk), x_map),
                # NOTE: if a profile shows exposed weight DMA, deepen buffering
                # here with pipeline_mode=pl.Buffered(3).
                pl.BlockSpec((tk, tn), w_map),
                pl.BlockSpec((1, tn), b_map),
            ],
            out_specs=pl.BlockSpec((tm, tn), o_map),
            scratch_shapes=scratch,
        ),
        compiler_params=pltpu.CompilerParams(
            dimension_semantics=("parallel", "parallel", "arbitrary"),
            vmem_limit_bytes=vmem_limit,
        ),
        cost_estimate=pl.CostEstimate(
            flops=flops, transcendentals=0, bytes_accessed=bytes_accessed
        ),
    )(x2d, w_t, b2d)

    return out2d.reshape(batch, seq, num_classes)


def _reference(x, weight, bias):
    return jnp.einsum("bsh,ch->bsc", x, weight) + bias


if __name__ == "__main__":
    # Small shapes consistent with the module's forward:
    #   x: (batch=2, seq=8, hidden=32), Linear(hidden=32 -> num_classes=64)
    batch, seq, hidden, num_classes = 2, 8, 32, 64

    key = jax.random.PRNGKey(0)
    kx, kw, kb = jax.random.split(key, 3)

    x = jax.random.normal(kx, (batch, seq, hidden), dtype=jnp.float32)
    bound = 1.0 / (hidden ** 0.5)
    weight = jax.random.uniform(
        kw, (num_classes, hidden), dtype=jnp.float32, minval=-bound, maxval=bound
    )
    bias = jax.random.uniform(
        kb, (num_classes,), dtype=jnp.float32, minval=-bound, maxval=bound
    )

    y = jax.block_until_ready(visual_to_semantic(x, weight, bias))
    y_ref = _reference(x, weight, bias)
    assert y.shape == (batch, seq, num_classes)
    assert jnp.allclose(y, y_ref, atol=1e-5, rtol=1e-5), "mismatch vs reference"

    # Ragged / larger case: M not a multiple of the tile, C not a multiple of
    # 128 -> exercises edge-tile masking without any wrapper pad/slice.
    b2, s2, h2, c2 = 3, 37, 256, 300
    x2 = jax.random.normal(kx, (b2, s2, h2), dtype=jnp.float32)
    w2 = jax.random.uniform(kw, (c2, h2), dtype=jnp.float32, minval=-0.05, maxval=0.05)
    bb2 = jax.random.uniform(kb, (c2,), dtype=jnp.float32, minval=-0.05, maxval=0.05)
    y2 = jax.block_until_ready(visual_to_semantic(x2, w2, bb2))
    assert jnp.allclose(y2, _reference(x2, w2, bb2), atol=1e-4, rtol=1e-4)

    # Same case with an explicit K tile -> exercises the accumulator path.
    y3 = jax.block_until_ready(visual_to_semantic(x2, w2, bb2, tile_k=128))
    assert jnp.allclose(y3, _reference(x2, w2, bb2), atol=1e-4, rtol=1e-4)

    print("KERNEL_OK")
</pallas_src>

<mosaic_0001>
module attributes {stable_mosaic.version = 11 : i64} {
  func.func @_linear_kernel_direct(%arg0: i32, %arg1: i32, %arg2: i32, %arg3: memref<8x32xf32, #tpu.memory_space<vmem>>, %arg4: memref<32x128xf32, #tpu.memory_space<vmem>>, %arg5: memref<1x128xf32, #tpu.memory_space<vmem>>, %arg6: memref<8x128xf32, #tpu.memory_space<vmem>>) attributes {dimension_semantics = [#tpu.dimension_semantics<parallel>, #tpu.dimension_semantics<parallel>, #tpu.dimension_semantics<arbitrary>], iteration_bounds = array<i64: 2, 1, 1>, scalar_prefetch = 0 : i64, scratch_operands = 0 : i64, tpu.core_type = #tpu.core_type<tc>, window_params = [{transform_indices = @transform_0, window_bounds = array<i64: 8, 32>}, {transform_indices = @transform_1, window_bounds = array<i64: 32, 128>}, {transform_indices = @transform_2, window_bounds = array<i64: 1, 128>}, {transform_indices = @transform_3, window_bounds = array<i64: 8, 128>}]} {
    %c0 = arith.constant 0 : index
    %c0_0 = arith.constant 0 : index
    %0 = vector.load %arg3[%c0, %c0_0] : memref<8x32xf32, #tpu.memory_space<vmem>>, vector<8x32xf32>
    %c0_1 = arith.constant 0 : index
    %c0_2 = arith.constant 0 : index
    %1 = vector.load %arg4[%c0_1, %c0_2] : memref<32x128xf32, #tpu.memory_space<vmem>>, vector<32x128xf32>
    %cst = arith.constant dense<0.000000e+00> : vector<8x128xf32>
    %2 = tpu.matmul %0, %1, %cst {dimension_numbers = #tpu.dot_dimension_numbers<[1], [0], [0], [1], [0, 0, 1, 1], [], []>} : vector<8x32xf32>, vector<32x128xf32>, vector<8x128xf32> -> vector<8x128xf32>
    %c0_3 = arith.constant 0 : index
    %c0_4 = arith.constant 0 : index
    %3 = vector.load %arg5[%c0_3, %c0_4] : memref<1x128xf32, #tpu.memory_space<vmem>>, vector<1x128xf32>
    %4 = vector.broadcast %3 : vector<1x128xf32> to vector<8x128xf32>
    %5 = arith.addf %2, %4 : vector<8x128xf32>
    %c0_5 = arith.constant 0 : index
    %c0_6 = arith.constant 0 : index
    %6 = vector.load %arg6[%c0_5, %c0_6] : memref<8x128xf32, #tpu.memory_space<vmem>>, vector<8x128xf32>
    tpu.vector_store %arg6[%c0_5, %c0_6], %5 {strides = array<i32>} : memref<8x128xf32, #tpu.memory_space<vmem>>, vector<8x128xf32>,
    return
  }
  func.func @transform_0(%arg0: i32, %arg1: i32, %arg2: i32) -> (i32, i32) {
    %c0_i32 = arith.constant 0 : i32
    return %arg0, %arg2 : i32, i32
  }
  func.func @transform_1(%arg0: i32, %arg1: i32, %arg2: i32) -> (i32, i32) {
    %c0_i32 = arith.constant 0 : i32
    return %arg2, %arg1 : i32, i32
  }
  func.func @transform_2(%arg0: i32, %arg1: i32, %arg2: i32) -> (i32, i32) {
    %c0_i32 = arith.constant 0 : i32
    %c0_i32_0 = arith.constant 0 : i32
    return %c0_i32, %arg1 : i32, i32
  }
  func.func @transform_3(%arg0: i32, %arg1: i32, %arg2: i32) -> (i32, i32) {
    %c0_i32 = arith.constant 0 : i32
    return %arg0, %arg1 : i32, i32
  }
}

</mosaic_0001>

<bundles_post_ra>
// kernel: visual_to_semantic.1
= control target key start
LH: loop header
LB: loop body
LE: loop exit
PB: predicated region body
PF: predicated region fallthrough
CT: control target
= control target key end

     0   :  { %8 = vsyncpa [#allocation3], 0  ;;  %s971_s0 = inlined_call_operand.hbm [shape: f32[16,32], index: 0, kind: input, shape index: {}]   ;;  %s972_s1 = inlined_call_operand.hbm [shape: f32[32,64], index: 1, kind: input, shape index: {}]   ;;  %s973_s2 = inlined_call_operand.vmem [shape: f32[1,64], index: 2, kind: input, shape index: {}]   ;;  %s974_s3 = inlined_call_operand.hbm [shape: f32[16,64], index: 3, kind: output, shape index: {}]  }
   0x1   :  { %10 = vsyncpa [#allocation3 + $0x1], 0 }
   0x2   :  { %11 = vsyncpa [#allocation6], 0 }
   0x3   :  { %12 = vsyncpa [#allocation4], 0 }
   0x4   :  { %14 = vsyncpa [#allocation4 + $0x1], 0  ;;  %s754_s12 = smov 0   ;;  %s756_s13 = smov 0  }
   0x5   :  { %s758_s14 = smov 0   ;;  %s760_s15 = smov 0  }
   0x6   :  { %s762_s16 = smov 0   ;;  %s764_s17 = smov 0  }
   0x7 LB: > { %s462_s18 = sadd.s32 4294967295, %s724_s17   ;;  %s463_s19 = sadd.s32 4294967294, %s724_s17   ;;  %s724_s17 = sphi %s764_s17, %s20_s17   ;;  %s720_s16 = sphi %s762_s16, %s998_s16   ;;  %s716_s15 = sphi %s760_s15, %s997_s15   ;;  %s712_s14 = sphi %s758_s14, %s996_s14   ;;  %s708_s13 = sphi %s756_s13, %s995_s13   ;;  %s704_s12 = sphi %s754_s12, %s994_s12  }
   0x8   : > { %p61_p0 = scmp.ne.s32.totalorder %s708_s13, %s704_s12  ;;  %p788_p1 = scmp.eq.s32.totalorder %s462_s18, 0 }
   0x9   : > { %p792_p2 = scmp.eq.s32.totalorder %s462_s18, 1  ;;  %p147_p3 = scmp.eq.s32.totalorder %s463_s19, 1 }
   0xa   : > { %s979_s20 = scalar_select %p788_p1, 1, 0 }
   0xb   : > { %s980_s21 = scalar_select %p792_p2, 1, 0 }
   0xc   : > { %p798_p4 = por %p788_p1, %p61_p0  ;;  %p464_p5 = scmp.ge.s32.totalorder %s724_s17, 1 }
   0xd   : > { %p803_p6 = por %p147_p3, %p61_p0  ;;  %p154_p7 = scmp.lt.s32.totalorder %s724_s17, 3 }
   0xe   : > { %s981_s22 = scalar_select %p798_p4, 1, 0 }
   0xf   : > { %s982_s23 = scalar_select %p803_p6, 1, 0 }
  0x10   : > { %p808_p8 = pnand %p464_p5, %p154_p7  ;;  %s726_s25 = smov [#allocation5]  }
  0x11   : > { %s170_s26 = sshll.u32 %s726_s25, 4  ;;  %s39_s28 = sadd.s32 1, %s720_s16  ;;  %s171_s26 = int_to_ptr.vmem [resolvable:$true] %s170_s26 }
  0x12   : > { %s983_s24 = scalar_select %p808_p8, 1, 0 }
  0x13   : > { %p510_p9 = pneg %p808_p8  ;;  %s580_s4 = scalar_lea.hbm %s972_s1, 512 }
  0x14   : > { %p581_p12 = scmp.ne.s32.totalorder %s972_s1, %s580_s4  ;;  %p587_p5 = scmp.lt.u32.totalorder %s580_s4, %s972_s1 }
  0x15   : > { %p817_p11 = pnand %p510_p9, %p788_p1 }
  0x17   : > { %p582_p13 = pneg %p817_p11 }
  0x19   : > { %p583_p0 = pnand %p582_p13, %p581_p12 }
  0x1b   : > { %p584_p3 = pneg %p583_p0 }
  0x1d   : > { %p589_p7 = pnand %p587_p5, %p584_p3 }
  0x1f   : > { %592 = shalt.err (!%p589_p7)
}
  0x20   : > { %s593_s9 = scalar_lea.vmem %s171_s26, 512  ;;  %p601_p1 = scmp.lt.s32.totalorder %s171_s26, %s171_s26 }
  0x21   : > { %p594_p9 = scmp.ne.s32.totalorder %s171_s26, %s593_s9  ;;  %p602_p4 = scmp.lt.s32.totalorder %s593_s9, %s593_s9 }
  0x23   : > { %p596_p10 = pnand %p594_p9, %p582_p13  ;;  %p603_p8 = por %p602_p4, %p601_p1 }
  0x25   : > { %p597_p6 = pneg %p596_p10 }
  0x27   : > { %p604_p2 = pnand %p603_p8, %p597_p6 }
  0x29   : > { %607 = shalt.err (!%p604_p2)
}
  0x2a   : > { %s727_s10 = smov 128   ;;  %s728_s11 = smov 8  }
  0x2b   : > { %513 = dma.hbm_to_vmem [thread:$0]  (!%p817_p11), %s972_s1, 512, %s171_s26, [#allocation6], %s727_s10, %s727_s10, %s728_s11  }
  0x2c   : > { %p41_p1 = scmp.ge.s32.totalorder %s39_s28, 2  ;;  %s48_s25 = sadd.s32 1, %s712_s14 }
  0x2d   : > { %p55_p2 = scmp.ne.s32.totalorder %s712_s14, %s708_s13  ;;  %p56_p4 = scmp.eq.s32.totalorder %s724_s17, 0 }
  0x2e   : > { %s1000_s28 = smov (%p41_p1, %s39_s28), 0  ;;  %p986_p8 = scmp.ne.s32.totalorder %s980_s21, 0 }
  0x2f   : > { %p844_p6 = por %p56_p4, %p55_p2  ;;  %s43_s27 = ssub.s32 %s720_s16, %s1000_s28 }
  0x30   : > { %p850_p10 = por %p986_p8, %p55_p2  ;;  %p523_p12 = scmp.lt.s32.totalorder %s724_s17, 2 }
  0x31   : > { %p46_p11 = scmp.eq.s32.totalorder %s43_s27, 0  ;;  %s190_s26 = sand.u32 1, %s712_s14  }
  0x32   : > { %s468_s4 = sshll.u32 %s190_s26, 3  ;;  %s469_s6 = sshll.u32 %s720_s16, 7 }
  0x33   : > { %s859_s5 = scalar_select %p46_p11, %s712_s14, %s48_s25  }
  0x34   : > { %s865_s9 = scalar_lea.hbm %s971_s0, %s469_s6  ;;  %s194_s21 = scalar_lea.vmem [#allocation2], %s468_s4 }
  0x35   : > { %s202_s10 = sshll.u32 %s194_s21, 4  ;;  %p871_p13 = pnand %p523_p12, %p844_p6  ;;  %s867_s10 = int_to_ptr.vmem [resolvable:$true] %s202_s10 }
  0x36   : > { %s191_s18 = scalar_lea.sflag [#allocation3], %s190_s26  ;;  %s608_s19 = scalar_lea.hbm %s865_s9, 128 }
  0x37   : > { %p609_p0 = scmp.ne.s32.totalorder %s865_s9, %s608_s19  ;;  %p610_p3 = pneg %p871_p13 }
  0x38   : > { %s613_s4 = scalar_lea.hbm %s971_s0, 256  ;;  %p614_p9 = scmp.lt.u32.totalorder %s865_s9, %s971_s0 }
  0x39   : > { %p611_p5 = pnand %p610_p3, %p609_p0  ;;  %p615_p1 = scmp.lt.u32.totalorder %s613_s4, %s608_s19 }
  0x3a   : > { %p617_p4 = scmp.lt.u32.totalorder %s608_s19, %s865_s9 }
  0x3b   : > { %p612_p7 = pneg %p611_p5  ;;  %p616_p2 = por %p615_p1, %p614_p9 }
  0x3d   : > { %p618_p6 = por %p617_p4, %p616_p2 }
  0x3f   : > { %p619_p8 = pnand %p618_p6, %p612_p7 }
  0x41   : > { %622 = shalt.err (!%p619_p8)
}
  0x42   : > { %s623_s26 = scalar_lea.vmem %s867_s10, 128  ;;  %s729_s7 = smov [#allocation2]  }
  0x43   : > { %p624_p12 = scmp.ne.s32.totalorder %s867_s10, %s623_s26  ;;  %s628_s8 = sshll.u32 %s729_s7, 4  ;;  %s629_s8 = int_to_ptr.vmem [resolvable:$false] %s628_s8 }
  0x44   : > { %s630_s21 = scalar_lea.vmem %s629_s8, 256  ;;  %p631_p5 = scmp.lt.s32.totalorder %s867_s10, %s629_s8 }
  0x45   : > { %p626_p11 = pnand %p624_p12, %p610_p3  ;;  %p632_p9 = scmp.lt.s32.totalorder %s630_s21, %s623_s26 }
  0x47   : > { %p627_p0 = pneg %p626_p11  ;;  %p633_p1 = por %p632_p9, %p631_p5 }
  0x49   : > { %p634_p2 = pnand %p633_p1, %p627_p0 }
  0x4b   : > { %637 = shalt.err (!%p634_p2)
}
  0x4c   : > { %517 = dma.hbm_to_vmem [thread:$0]  (!%p871_p13), %s865_s9, 128, %s867_s10, %s191_s18  }
  0x4d   : > { %p989_p7 = scmp.ne.s32.totalorder %s983_s24, 0 }
  0x4e   : > { %s903_s19 = sand.u32 (!%p989_p7), 1, %s708_s13   ;;  %p990_p3 = scmp.ne.s32.totalorder (!%p989_p7), %s981_s22, 0 }
  0x4f   : > { %211 = sbr.rel (%p989_p7) target bundleno = 329 (0x149), region = 32  ;;  %s471_s25 = sshll.u32 (!%p989_p7), %s903_s19, 3 }
  0x50   : > { %s214_s27 = scalar_lea.sflag (!%p989_p7), [#allocation3], %s903_s19  ;;  %s217_s4 = scalar_lea.vmem (!%p989_p7), [#allocation2], %s471_s25 }
  0x56   : > { %691 = dma.done.wait (%p990_p3), %s214_s27, 128  }
  0x57   : > { %693 = vsyncadd (%p990_p3), %s214_s27, 4294967168  ;;  %p991_p4 = scmp.ne.s32.totalorder %s979_s20, 0 }
  0x59   : > { %695 = dma.done.wait (%p991_p4), [#allocation6], 512  }
  0x5a   : > { %697 = vsyncadd (%p991_p4), [#allocation6], 4294966784  ;;  %v730_v0 = vmov 0.0|0.0   ;;  %vm731_vm0 = vmmov 0   ;;  %v732_v1 = vmov 0.0   ;;  %v252_v2 = vld [vmem:[#allocation5] sm:$0xff] }
  0x5b   : > { %496 = vmatprep.subr.bf16.mxu0 %v730_v0  ;;  %493 = vmatprep.mubr.msk.f32.mxu0 %vm731_vm0, %v732_v1  ;;  %v253_v3 = vld [vmem:[#allocation5 + $0x8] sm:$0xff]  ;;  %v254_v4 = vld [vmem:[#allocation5 + $0x10] sm:$0xff]  ;;  %v255_v6 = vld [vmem:[#allocation5 + $0x18] sm:$0xff]  ;;  %vm263_vm1 = vcmask 261120   ;;  %s477_s24 = sshll.u32 %s716_s15, 7  ;;  %s246_s9 = scalar_lea.vmem [#allocation7], %s471_s25 }
  0x5c   : > { %v497_v5 = vpack.c.bf16 %v253_v3, %v252_v2  ;;  %v500_v7 = vpack.c.bf16 %v255_v6, %v254_v4  ;;  %v251_v8 = vld [vmem:[%s217_s4] sm:$0xff]  ;;  %s353_s10 = sshll.u32 %s246_s9, 4  ;;  %s922_s29 = scalar_lea.hbm %s974_s3, %s477_s24  ;;  %s924_s10 = int_to_ptr.vmem [resolvable:$true] %s353_s10 }
  0x5d   : > { %v474_v9 = vld [vmem:[%s973_s2] ss:$0 sm:$0xff]  ;;  %s339_s6 = scalar_lea.sflag [#allocation4], %s903_s19  ;;  %s638_s26 = scalar_lea.vmem %s924_s10, 128 }
  0x5e   : > { %498 = vmatpush3.bf16.msra.mxu0 %v497_v5  ;;  %p639_p13 = scmp.ne.s32.totalorder %s924_s10, %s638_s26  ;;  %s733_s15 = smov [#allocation7]  }
  0x5f   : > { %499 = vmatprep.subr.bf16.mxu0 %v730_v0  ;;  %s642_s7 = sshll.u32 %s733_s15, 4  ;;  %s643_s7 = int_to_ptr.vmem [resolvable:$false] %s642_s7 }
  0x60   : > { %p640_p6 = pnand %p639_p13, %p850_p10  ;;  %s644_s8 = scalar_lea.vmem %s643_s7, 256 }
  0x61   : > { %p645_p12 = scmp.lt.s32.totalorder %s924_s10, %s643_s7  ;;  %p646_p11 = scmp.lt.s32.totalorder %s644_s8, %s638_s26 }
  0x62   : > { %501 = vmatpush3.bf16.msra.mxu0 %v500_v7  ;;  %p641_p8 = pneg %p640_p6 }
  0x63   : > { %p647_p0 = por %p646_p11, %p645_p12 }
  0x65   : > { %494 = vmatmul.mubr.msk.f32.vlgmr.msra.gmra.mrb[0].mxu0 %vm263_vm1, %v251_v8  ;;  %p648_p5 = pnand %p647_p0, %p641_p8 }
 0x138   : > { %v333_v10 = vpop.f32.mrb[0].mxu0 }
 0x139   : > { %v334_v11 = vadd.f32 %v474_v9, %v333_v10  ;;  %v495_v12 = vpop.f32.mrb[1].mxu0 }
 0x13b   : > { %337 = vst [vmem:[%s246_s9] sm:$0xff] %v334_v11 }
 0x13c   : > { %651 = shalt.err (!%p648_p5)
}
 0x13d   : > { %s652_s21 = scalar_lea.hbm %s922_s29, 128  ;;  %s656_s27 = scalar_lea.hbm %s974_s3, 256 }
 0x13e   : > { %p653_p9 = scmp.ne.s32.totalorder %s922_s29, %s652_s21  ;;  %p657_p7 = scmp.lt.u32.totalorder %s922_s29, %s974_s3 }
 0x13f   : > { %p658_p3 = scmp.lt.u32.totalorder %s656_s27, %s652_s21  ;;  %p660_p13 = scmp.lt.u32.totalorder %s652_s21, %s922_s29 }
 0x140   : > { %p654_p1 = pnand %p653_p9, %p850_p10 }
 0x141   : > { %p659_p4 = por %p658_p3, %p657_p7 }
 0x142   : > { %p655_p2 = pneg %p654_p1 }
 0x143   : > { %p661_p6 = por %p660_p13, %p659_p4 }
 0x145   : > { %p662_p8 = pnand %p661_p6, %p655_p2 }
 0x147   : > { %665 = shalt.err (!%p662_p8)
}
 0x148   : > { %508 = dma.vmem_to_hbm [thread:$0]  (%p850_p10), %s924_s10, 128, %s922_s29, %s339_s6  }
 0x149 PF: > { %s365_s22 = sand.u32 1, %s704_s12   ;;  %p992_p12 = scmp.ne.s32.totalorder %s982_s23, 0 }
 0x14a   : > { %p993_p11 = scmp.ge.s32.totalorder %s724_s17, 2  ;;  %s366_s24 = scalar_lea.sflag [#allocation4], %s365_s22 }
 0x14c   : > { %p519_p0 = pnand %p993_p11, %p992_p12 }
 0x14e   : > { %699 = dma.done.wait (!%p519_p0), %s366_s24, 128  }
 0x14f   : > { %701 = vsyncadd (!%p519_p0), %s366_s24, 4294967168  ;;  %s20_s17 = sadd.s32 1, %s724_s17   ;;  %s994_s12 = smov %s708_s13 }
 0x150   : > { %p17_p5 = scmp.ge.s32.totalorder %s20_s17, 4   ;;  %s995_s13 = smov %s712_s14 }
 0x151   : > { %s996_s14 = smov %s859_s5  ;;  %s997_s15 = smov %s720_s16 }
 0x152   : > { %s998_s16 = smov %s1000_s28  ;;  %19 = sbr.rel (!%p17_p5) target bundleno = 7 (0x7), region = 85 }
 0x159   :  { %371 = vsyncpa [#allocation3], 1 }
 0x15a   :  { %373 = vsyncpa [#allocation3 + $0x1], 1 }
 0x15b   :  { %374 = vsyncpa [#allocation6], 1 }
 0x15c   :  { %375 = vsyncpa [#allocation4], 1 }
 0x15d   :  { %377 = vsyncpa [#allocation4 + $0x1], 1 }

</bundles_post_ra>
